<compile_context>
chip_gen: v5e
topology: v5e:2x2
jax: 0.10.0
libtpu: 0.0.40
codegen_flags: <defaults>
</compile_context>

<pallas_src>
import jax
import jax.numpy as jnp
from jax.experimental import pallas as pl
from jax.experimental.pallas import tpu as pltpu

_BLOCK_ELEMS = 512 * 1024          # ~2 MiB per f32 block
_LANE_CANDIDATES = (4096, 2048, 1024, 512, 256, 128)
_DEFAULT_LANES = 1024
_MIN_PALLAS_ELEMS = 1 << 18        # ~1 MiB f32: below this, use fused XLA path

_ONE_SIXTH = 1.0 / 6.0


def _hard_sigmoid_kernel(x_ref, o_ref):
    x = x_ref[...]
    # relu6(x + 3) / 6  (multiply by 1/6: cheaper than a true divide, same
    # result to within 1 ulp and well inside the op's accuracy needs).
    o_ref[...] = (jnp.clip(x + 3.0, 0.0, 6.0) * _ONE_SIXTH).astype(o_ref.dtype)


def _pick_lanes(n: int) -> int:
    """Widest lane-multiple-of-128 slab width that divides n (no padding)."""
    for w in _LANE_CANDIDATES:
        if n % w == 0:
            return w
    return _DEFAULT_LANES  # ragged size: fall back to padding with 1024 lanes


def _hard_sigmoid_pallas_impl(x: jax.Array) -> jax.Array:
    """Pallas path: works for any shape / float dtype."""
    orig_shape = x.shape
    orig_dtype = x.dtype
    n = x.size

    lanes = _pick_lanes(n)
    rows = pl.cdiv(n, lanes)
    n_padded = rows * lanes

    x_flat = jnp.ravel(x)
    padded = n_padded != n
    if padded:
        # Rare ragged case (< one slab row of pad). TODO(synk): could mask the
        # tail in-kernel to avoid the extra pad/slice HBM pass.
        x_flat = jnp.pad(x_flat, (0, n_padded - n))
    x2d = x_flat.reshape(rows, lanes)

    # ~2 MiB blocks; block_rows stays a multiple of 32 for any lane width.
    block_rows = max(_BLOCK_ELEMS // lanes, 8)
    br = min(block_rows, rows)  # full-extent block is always layout-legal
    grid = (pl.cdiv(rows, br),)

    out2d = pl.pallas_call(
        _hard_sigmoid_kernel,
        out_shape=jax.ShapeDtypeStruct((rows, lanes), orig_dtype),
        grid_spec=pltpu.PrefetchScalarGridSpec(
            num_scalar_prefetch=0,
            grid=grid,
            in_specs=[pl.BlockSpec((br, lanes), lambda i: (i, 0))],
            out_specs=pl.BlockSpec((br, lanes), lambda i: (i, 0)),
        ),
        compiler_params=pltpu.CompilerParams(
            dimension_semantics=("parallel",),
        ),
    )(x2d)

    if padded:
        return out2d.reshape(-1)[:n].reshape(orig_shape)
    return out2d.reshape(orig_shape)


def hard_sigmoid_pallas(x: jax.Array) -> jax.Array:
    """Elementwise hard-sigmoid, matching PyTorch relu6(x + 3) / 6."""
    if x.size < _MIN_PALLAS_ELEMS:
        # Tiny activations: pallas_call launch + reshape overhead dominates by
        # 10-100x; XLA fuses these few VPU ops into the producer for free.
        return jnp.clip(x + 3.0, 0.0, 6.0) * _ONE_SIXTH
    return _hard_sigmoid_pallas_impl(x)


def hard_sigmoid_ref(x: jax.Array) -> jax.Array:
    return jnp.clip(x + 3.0, 0.0, 6.0) / 6.0


if __name__ == "__main__":
    key = jax.random.PRNGKey(0)
    k0, k1 = jax.random.split(key)

    # Small NCHW activation consistent with the PyTorch module's usage.
    x_small = jax.random.normal(k0, (2, 4, 16, 16), dtype=jnp.float32) * 4.0

    # 1) Public wrapper on the small shape (fused fallback path).
    y_small = hard_sigmoid_pallas(x_small)
    jax.block_until_ready(y_small)
    assert y_small.shape == x_small.shape and y_small.dtype == x_small.dtype
    assert jnp.allclose(y_small, hard_sigmoid_ref(x_small), atol=1e-6, rtol=1e-6)

    # 2) Force the Pallas kernel path on the same small shape (kernel
    #    correctness + adaptive slab / partial-block handling; 2048 elems
    #    picks a 2048-lane slab with a single full-extent block).
    y_small_k = _hard_sigmoid_pallas_impl(x_small)
    jax.block_until_ready(y_small_k)
    assert y_small_k.shape == x_small.shape and y_small_k.dtype == x_small.dtype
    assert jnp.allclose(y_small_k, hard_sigmoid_ref(x_small), atol=1e-6, rtol=1e-6)

    # 3) Ragged size (not a multiple of 128) to exercise the padded path.
    x_ragged = jax.random.normal(k1, (3, 5, 7, 11), dtype=jnp.float32) * 4.0
    y_ragged = _hard_sigmoid_pallas_impl(x_ragged)
    jax.block_until_ready(y_ragged)
    assert y_ragged.shape == x_ragged.shape and y_ragged.dtype == x_ragged.dtype
    assert jnp.allclose(y_ragged, hard_sigmoid_ref(x_ragged), atol=1e-6, rtol=1e-6)

    # 4) Medium activation through the public wrapper (262144 elems, aligned
    #    -> 4096-lane slab, no padding, multi-row block).
    x_med = jax.random.normal(k1, (2, 32, 64, 64), dtype=jnp.float32) * 4.0
    y_med = hard_sigmoid_pallas(x_med)
    jax.block_until_ready(y_med)
    assert y_med.shape == x_med.shape and y_med.dtype == x_med.dtype
    assert jnp.allclose(y_med, hard_sigmoid_ref(x_med), atol=1e-6, rtol=1e-6)

    # 5) bf16 input (common for PP-LCNet inference); block_rows multiple of 32
    #    keeps sublane packing clean.
    x_bf16 = x_med.astype(jnp.bfloat16)
    y_bf16 = _hard_sigmoid_pallas_impl(x_bf16)
    jax.block_until_ready(y_bf16)
    assert y_bf16.dtype == jnp.bfloat16 and y_bf16.shape == x_bf16.shape
    assert jnp.allclose(y_bf16.astype(jnp.float32),
                        hard_sigmoid_ref(x_bf16).astype(jnp.float32),
                        atol=1e-2, rtol=1e-2)

    print("KERNEL_OK")
</pallas_src>

<mosaic_0001>
module attributes {stable_mosaic.version = 11 : i64} {
  func.func @_hard_sigmoid_kernel(%arg0: i32, %arg1: memref<1x2048xf32, #tpu.memory_space<vmem>>, %arg2: memref<1x2048xf32, #tpu.memory_space<vmem>>) attributes {dimension_semantics = [#tpu.dimension_semantics<parallel>], iteration_bounds = array<i64: 1>, scalar_prefetch = 0 : i64, scratch_operands = 0 : i64, tpu.core_type = #tpu.core_type<tc>, window_params = [{transform_indices = @transform_0, window_bounds = array<i64: 1, 2048>}, {transform_indices = @transform_1, window_bounds = array<i64: 1, 2048>}]} {
    %c0 = arith.constant 0 : index
    %c0_0 = arith.constant 0 : index
    %0 = vector.load %arg1[%c0, %c0_0] : memref<1x2048xf32, #tpu.memory_space<vmem>>, vector<1x2048xf32>
    %cst = arith.constant 3.000000e+00 : f32
    %1 = vector.broadcast %cst : f32 to vector<1x2048xf32>
    %2 = arith.addf %0, %1 : vector<1x2048xf32>
    %cst_1 = arith.constant 0.000000e+00 : f32
    %cst_2 = arith.constant 6.000000e+00 : f32
    %3 = vector.broadcast %cst_1 : f32 to vector<1x2048xf32>
    %4 = arith.maximumf %3, %2 : vector<1x2048xf32>
    %5 = vector.broadcast %cst_2 : f32 to vector<1x2048xf32>
    %6 = arith.minimumf %5, %4 : vector<1x2048xf32>
    %cst_3 = arith.constant 0.166666672 : f32
    %7 = vector.broadcast %cst_3 : f32 to vector<1x2048xf32>
    %8 = arith.mulf %6, %7 : vector<1x2048xf32>
    %c0_4 = arith.constant 0 : index
    %c0_5 = arith.constant 0 : index
    %9 = vector.load %arg2[%c0_4, %c0_5] : memref<1x2048xf32, #tpu.memory_space<vmem>>, vector<1x2048xf32>
    tpu.vector_store %arg2[%c0_4, %c0_5], %8 {strides = array<i32>} : memref<1x2048xf32, #tpu.memory_space<vmem>>, vector<1x2048xf32>,
    return
  }
  func.func @transform_0(%arg0: i32) -> (i32, i32) {
    %c0_i32 = arith.constant 0 : i32
    %c0_i32_0 = arith.constant 0 : i32
    return %arg0, %c0_i32 : i32, i32
  }
  func.func @transform_1(%arg0: i32) -> (i32, i32) {
    %c0_i32 = arith.constant 0 : i32
    %c0_i32_0 = arith.constant 0 : i32
    return %arg0, %c0_i32 : i32, i32
  }
}

</mosaic_0001>

<bundles_post_ra>
// kernel: tpu_custom_call.1
= control target key start
LH: loop header
LB: loop body
LE: loop exit
PB: predicated region body
PF: predicated region fallthrough
CT: control target
= control target key end

     0   :  { %6 = vsyncpa [#allocation3], 0  ;;  %s124_s0 = inlined_call_operand.hbm [shape: f32[1,2048], index: 0, kind: input, shape index: {}]   ;;  %s125_s1 = inlined_call_operand.hbm [shape: f32[1,2048], index: 1, kind: output, shape index: {}]  }
   0x1   :  { %7 = vsyncpa [#allocation4], 0  ;;  %s13_s8 = sshll.u32 %s124_s0, 4  ;;  %s106_s9 = smov [#allocation2]   ;;  %s14_s8 = int_to_ptr.hbm [resolvable:$true] %s13_s8 }
   0x2   :  { %s15_s10 = sshll.u32 %s106_s9, 4  ;;  %s16_s10 = int_to_ptr.vmem [resolvable:$true] %s15_s10 }
   0x3   :  { %18 = dma.hbm_to_vmem [thread:$0]  %s14_s8, 256, %s16_s10, [#allocation3]  }
   0x4   :  { %102 = dma.done.wait [#allocation3], 256  }
   0x5   :  { %103 = vsyncadd [#allocation3], 4294967040  ;;  %v23_v0 = vld [vmem:[#allocation2] sm:$0xff]  ;;  %v24_v1 = vld [vmem:[#allocation2 + $0x8] sm:$0xff]  ;;  %s107_s11 = smov [#allocation5]   ;;  %s42_s0 = sshll.u32 %s125_s1, 4  ;;  %s43_s0 = int_to_ptr.hbm [resolvable:$true] %s42_s0 }
   0x6   :  { %v25_v2 = vadd.f32 3.0, %v23_v0  ;;  %v26_v3 = vadd.f32 3.0, %v24_v1  ;;  %s40_s12 = sshll.u32 %s107_s11, 4  ;;  %s41_s12 = int_to_ptr.vmem [resolvable:$true] %s40_s12 }
   0x8   :  { %v27_v4 = vmax.f32 %v25_v2, 0.0  ;;  %v28_v5 = vmax.f32 %v26_v3, 0.0 }
   0xa   :  { %v29_v6 = vmin.f32 %v27_v4, 6.0  ;;  %v30_v7 = vmin.f32 %v28_v5, 6.0 }
   0xc   :  { %v31_v8 = vmul.f32 0.16666667, %v29_v6  ;;  %v32_v9 = vmul.f32 0.16666667, %v30_v7 }
   0xe   :  { %33 = vst [vmem:[#allocation5] sm:$0xff] %v31_v8 }
   0xf   :  { %34 = vst [vmem:[#allocation5 + $0x8] sm:$0xff] %v32_v9 }
  0x10   :  { %45 = dma.vmem_to_hbm [thread:$0]  %s41_s12, 256, %s43_s0, [#allocation4]  }
  0x11   :  { %104 = dma.done.wait [#allocation4], 256  }
  0x12   :  { %105 = vsyncadd [#allocation4], 4294967040 }
  0x13   :  { %50 = vsyncpa [#allocation3], 1 }
  0x14   :  { %51 = vsyncpa [#allocation4], 1 }

</bundles_post_ra>
